<compile_context>
chip_gen: v7x
topology: tpu7x:2x2x1
jax: 0.10.0
libtpu: 0.0.40
codegen_flags: <defaults>
</compile_context>

<pallas_src>
import math
import jax
import jax.numpy as jnp
from jax.experimental import pallas as pl
from jax.experimental.pallas import tpu as pltpu

# ---- model dimensions (concrete instantiation of the generic CNP) ----
X_DIM = 2      # x coordinate dim
Y_DIM = 1      # y value dim
HID = 32       # MLP hidden width
R_DIM = 32     # deterministic representation dim
DK = 32        # attention key/query dim


def cnp_kernel(xy_c_ref, x_t_ref,
               ew1_ref, eb1_ref, ew2_ref, eb2_ref,
               wqk_ref,
               dw1x_ref, dw1r_ref, db1_ref, dw2_ref, db2_ref,
               out_ref):
    xy_c = xy_c_ref[...]            # (BT, Nc, X_DIM + Y_DIM)
    x_t = x_t_ref[...]              # (BT, Nt, X_DIM)
    x_c = xy_c[..., :X_DIM]         # (BT, Nc, X_DIM)  -- free lane slice, no extra DMA

    # ---- deterministic encoder: MLP over concat(x_context, y_context) -> r_i ----
    h = jnp.einsum('bnd,df->bnf', xy_c, ew1_ref[...],
                   preferred_element_type=jnp.float32) + eb1_ref[...]
    h = jnp.maximum(h, 0.0)
    r_i = jnp.einsum('bnh,hf->bnf', h, ew2_ref[...],
                     preferred_element_type=jnp.float32) + eb2_ref[...]   # (BT, Nc, R_DIM)

    # ---- cross attention: queries = x_target, keys = x_context, values = r_i ----
    # Wqk = (Wq @ Wk^T) / sqrt(DK) precomputed in the wrapper (X_DIM, X_DIM);
    # scores = (x_t Wq)(x_c Wk)^T / sqrt(DK) = (x_t Wqk) . x_c  (no transpose, one matmul)
    qp = jnp.einsum('bqd,de->bqe', x_t, wqk_ref[...],
                    preferred_element_type=jnp.float32)                   # (BT, Nt, X_DIM)
    scores = jnp.einsum('bqe,bke->bqk', qp, x_c,
                        preferred_element_type=jnp.float32)               # (BT, Nt, Nc)
    scores = scores - jnp.max(scores, axis=-1, keepdims=True)
    p = jnp.exp(scores)
    attn = p * pl.reciprocal(jnp.sum(p, axis=-1, keepdims=True), approx=True)
    r_j = jnp.einsum('bqk,bkf->bqf', attn, r_i,
                     preferred_element_type=jnp.float32)                  # (BT, Nt, R_DIM)

    # ---- decoder: MLP over concat(x_target, r_j), split-weight form ----
    h2 = (jnp.einsum('bqd,df->bqf', x_t, dw1x_ref[...],
                     preferred_element_type=jnp.float32)
          + jnp.einsum('bqr,rf->bqf', r_j, dw1r_ref[...],
                       preferred_element_type=jnp.float32)
          + db1_ref[...])
    h2 = jnp.maximum(h2, 0.0)
    out = jnp.einsum('bqh,ho->bqo', h2, dw2_ref[...],
                     preferred_element_type=jnp.float32) + db2_ref[...]   # (BT, Nt, 2*Y_DIM)

    # columns [0, Y_DIM) are mu; columns [Y_DIM, 2*Y_DIM) become sigma via
    # a numerically stable softplus:  0.1 + 0.9 * softplus(log_sigma)
    sp = jnp.maximum(out, 0.0) + jnp.log1p(jnp.exp(-jnp.abs(out)))
    col = jax.lax.broadcasted_iota(jnp.int32, out.shape, dimension=2)
    out_ref[...] = jnp.where(col < Y_DIM, out, 0.1 + 0.9 * sp)


def init_params(key):
    """Deterministic nn.Linear-style uniform init, (in, out) weight layout."""
    def linear(key, fan_in, fan_out):
        kw, kb = jax.random.split(key)
        bound = 1.0 / math.sqrt(fan_in)
        w = jax.random.uniform(kw, (fan_in, fan_out), jnp.float32, -bound, bound)
        b = jax.random.uniform(kb, (1, fan_out), jnp.float32, -bound, bound)
        return w, b

    keys = jax.random.split(key, 6)
    ew1, eb1 = linear(keys[0], X_DIM + Y_DIM, HID)       # encoder layer 1
    ew2, eb2 = linear(keys[1], HID, R_DIM)               # encoder layer 2
    wq, _ = linear(keys[2], X_DIM, DK)                   # attention query proj (no bias)
    wk, _ = linear(keys[3], X_DIM, DK)                   # attention key proj (no bias)
    dw1x, db1 = linear(keys[4], X_DIM + R_DIM, HID)      # decoder layer 1 (split below)
    dw1r = dw1x[X_DIM:]                                   # (R_DIM, HID) part for r_j
    dw1x = dw1x[:X_DIM]                                   # (X_DIM, HID) part for x_target
    dw2, db2 = linear(keys[5], HID, 2 * Y_DIM)           # decoder output layer (mu, log_sigma)
    return (ew1, eb1, ew2, eb2, wq, wk, dw1x, dw1r, db1, dw2, db2)


def cnp_forward(params, x_context, y_context, x_target, y_target=None, batch_tile=None):
    ew1, eb1, ew2, eb2, wq, wk, dw1x, dw1r, db1, dw2, db2 = params
    # fuse Q/K projections once (no nonlinearity in between): (X_DIM, X_DIM), pre-scaled
    wqk = jnp.dot(wq, wk.T) * (1.0 / math.sqrt(DK))
    kernel_params = (ew1, eb1, ew2, eb2, wqk, dw1x, dw1r, db1, dw2, db2)

    B, Nc, _ = x_context.shape
    _, Nt, _ = x_target.shape
    xy_c = jnp.concatenate([x_context, y_context], axis=-1)   # (B, Nc, X_DIM + Y_DIM)

    # batch tile: as large as practical (VMEM use is only KBs at these shapes),
    # but keep >= 2 grid steps when B >= 2 so v7x's second TensorCore is used.
    if batch_tile is None:
        batch_tile = max(1, min(256, pl.cdiv(B, 2)))
    bt = batch_tile
    grid_b = pl.cdiv(B, bt)
    Bp = grid_b * bt
    x_t_in = x_target
    if Bp != B:
        pad = Bp - B
        xy_c = jnp.pad(xy_c, ((0, pad), (0, 0), (0, 0)))
        x_t_in = jnp.pad(x_t_in, ((0, pad), (0, 0), (0, 0)))

    def bspec(n_pts, feat):
        return pl.BlockSpec((bt, n_pts, feat), lambda b: (b, 0, 0))

    def wspec(shape):
        return pl.BlockSpec(shape, lambda b, _n=len(shape): (0,) * _n)

    in_specs = [bspec(Nc, X_DIM + Y_DIM), bspec(Nt, X_DIM)] + \
               [wspec(p.shape) for p in kernel_params]
    out_specs = bspec(Nt, 2 * Y_DIM)
    out_shape = jax.ShapeDtypeStruct((Bp, Nt, 2 * Y_DIM), jnp.float32)

    out = pl.pallas_call(
        cnp_kernel,
        grid=(grid_b,),
        in_specs=in_specs,
        out_specs=out_specs,
        out_shape=out_shape,
        compiler_params=pltpu.CompilerParams(dimension_semantics=("parallel",)),
    )(xy_c, x_t_in, *kernel_params)

    out = out[:B]                       # drop batch padding
    mu = out[..., :Y_DIM]
    sigma = out[..., Y_DIM:]

    if y_target is not None:
        # Normal(mu, sigma).log_prob(y).sum(-1); mean over all, negated.
        log_prob = (-0.5 * ((y_target - mu) / sigma) ** 2
                    - jnp.log(sigma)
                    - 0.5 * math.log(2.0 * math.pi)).sum(axis=-1)
        loss = -jnp.mean(log_prob)
    else:
        loss = None
    return mu, sigma, loss, None, None


if __name__ == "__main__":
    key = jax.random.PRNGKey(0)
    k_params, k_xc, k_yc, k_xt, k_yt = jax.random.split(key, 5)

    B, Nc, Nt = 2, 8, 8
    params = init_params(k_params)
    x_context = jax.random.normal(k_xc, (B, Nc, X_DIM), jnp.float32)
    y_context = jax.random.normal(k_yc, (B, Nc, Y_DIM), jnp.float32)
    x_target = jax.random.normal(k_xt, (B, Nt, X_DIM), jnp.float32)
    y_target = jax.random.normal(k_yt, (B, Nt, Y_DIM), jnp.float32)

    mu, sigma, loss, _, _ = cnp_forward(params, x_context, y_context, x_target, y_target)
    jax.block_until_ready((mu, sigma, loss))

    assert mu.shape == (B, Nt, Y_DIM) and sigma.shape == (B, Nt, Y_DIM)
    assert bool(jnp.all(sigma > 0.0))
    assert bool(jnp.isfinite(loss))
    print("KERNEL_OK")
</pallas_src>

<mosaic_0001>
module attributes {stable_mosaic.version = 11 : i64} {
  func.func @cnp_kernel(%arg0: i32, %arg1: memref<1x8x3xf32, #tpu.memory_space<vmem>>, %arg2: memref<1x8x2xf32, #tpu.memory_space<vmem>>, %arg3: memref<3x32xf32, #tpu.memory_space<vmem>>, %arg4: memref<1x32xf32, #tpu.memory_space<vmem>>, %arg5: memref<32x32xf32, #tpu.memory_space<vmem>>, %arg6: memref<1x32xf32, #tpu.memory_space<vmem>>, %arg7: memref<2x2xf32, #tpu.memory_space<vmem>>, %arg8: memref<2x32xf32, #tpu.memory_space<vmem>>, %arg9: memref<32x32xf32, #tpu.memory_space<vmem>>, %arg10: memref<1x32xf32, #tpu.memory_space<vmem>>, %arg11: memref<32x2xf32, #tpu.memory_space<vmem>>, %arg12: memref<1x2xf32, #tpu.memory_space<vmem>>, %arg13: memref<1x8x2xf32, #tpu.memory_space<vmem>>) attributes {dimension_semantics = [#tpu.dimension_semantics<parallel>], iteration_bounds = array<i64: 2>, scalar_prefetch = 0 : i64, scratch_operands = 0 : i64, tpu.core_type = #tpu.core_type<tc>, window_params = [{transform_indices = @transform_0, window_bounds = array<i64: 1, 8, 3>}, {transform_indices = @transform_1, window_bounds = array<i64: 1, 8, 2>}, {pipeline_mode = #tpu.pipeline_mode<synchronous>, transform_indices = @transform_2, window_bounds = array<i64: 3, 32>}, {pipeline_mode = #tpu.pipeline_mode<synchronous>, transform_indices = @transform_3, window_bounds = array<i64: 1, 32>}, {pipeline_mode = #tpu.pipeline_mode<synchronous>, transform_indices = @transform_4, window_bounds = array<i64: 32, 32>}, {pipeline_mode = #tpu.pipeline_mode<synchronous>, transform_indices = @transform_5, window_bounds = array<i64: 1, 32>}, {pipeline_mode = #tpu.pipeline_mode<synchronous>, transform_indices = @transform_6, window_bounds = array<i64: 2, 2>}, {pipeline_mode = #tpu.pipeline_mode<synchronous>, transform_indices = @transform_7, window_bounds = array<i64: 2, 32>}, {pipeline_mode = #tpu.pipeline_mode<synchronous>, transform_indices = @transform_8, window_bounds = array<i64: 32, 32>}, {pipeline_mode = #tpu.pipeline_mode<synchronous>, transform_indices = @transform_9, window_bounds = array<i64: 1, 32>}, {pipeline_mode = #tpu.pipeline_mode<synchronous>, transform_indices = @transform_10, window_bounds = array<i64: 32, 2>}, {pipeline_mode = #tpu.pipeline_mode<synchronous>, transform_indices = @transform_11, window_bounds = array<i64: 1, 2>}, {transform_indices = @transform_12, window_bounds = array<i64: 1, 8, 2>}]} {
    %c0 = arith.constant 0 : index
    %c0_0 = arith.constant 0 : index
    %c0_1 = arith.constant 0 : index
    %0 = vector.load %arg1[%c0, %c0_0, %c0_1] : memref<1x8x3xf32, #tpu.memory_space<vmem>>, vector<1x8x3xf32>
    %c0_2 = arith.constant 0 : index
    %c0_3 = arith.constant 0 : index
    %c0_4 = arith.constant 0 : index
    %1 = vector.load %arg2[%c0_2, %c0_3, %c0_4] : memref<1x8x2xf32, #tpu.memory_space<vmem>>, vector<1x8x2xf32>
    %2 = vector.extract_strided_slice %0 {offsets = [0, 0, 0], sizes = [1, 8, 2], strides = [1, 1, 1]} : vector<1x8x3xf32> to vector<1x8x2xf32>
    %c0_5 = arith.constant 0 : index
    %c0_6 = arith.constant 0 : index
    %3 = vector.load %arg3[%c0_5, %c0_6] : memref<3x32xf32, #tpu.memory_space<vmem>>, vector<3x32xf32>
    "tpu.trace_start"() <{level = 10 : i32, message = "bnd,df->bnf"}> : () -> ()
    %cst = arith.constant dense<0.000000e+00> : vector<1x8x32xf32>
    %4 = tpu.matmul %0, %3, %cst {dimension_numbers = #tpu.dot_dimension_numbers<[2], [0], [0, 1], [1], [0, 0, 0, 1, 1, 1], [], []>} : vector<1x8x3xf32>, vector<3x32xf32>, vector<1x8x32xf32> -> vector<1x8x32xf32>
    "tpu.trace_stop"() : () -> ()
    %c0_7 = arith.constant 0 : index
    %c0_8 = arith.constant 0 : index
    %5 = vector.load %arg4[%c0_7, %c0_8] : memref<1x32xf32, #tpu.memory_space<vmem>>, vector<1x32xf32>
    %6 = vector.shape_cast %5 : vector<1x32xf32> to vector<1x1x32xf32>
    %7 = vector.broadcast %6 : vector<1x1x32xf32> to vector<1x8x32xf32>
    %8 = arith.addf %4, %7 : vector<1x8x32xf32>
    %cst_9 = arith.constant 0.000000e+00 : f32
    %9 = vector.broadcast %cst_9 : f32 to vector<1x8x32xf32>
    %10 = arith.maximumf %8, %9 : vector<1x8x32xf32>
    %c0_10 = arith.constant 0 : index
    %c0_11 = arith.constant 0 : index
    %11 = vector.load %arg5[%c0_10, %c0_11] : memref<32x32xf32, #tpu.memory_space<vmem>>, vector<32x32xf32>
    "tpu.trace_start"() <{level = 10 : i32, message = "bnh,hf->bnf"}> : () -> ()
    %cst_12 = arith.constant dense<0.000000e+00> : vector<1x8x32xf32>
    %12 = tpu.matmul %10, %11, %cst_12 {dimension_numbers = #tpu.dot_dimension_numbers<[2], [0], [0, 1], [1], [0, 0, 0, 1, 1, 1], [], []>} : vector<1x8x32xf32>, vector<32x32xf32>, vector<1x8x32xf32> -> vector<1x8x32xf32>
    "tpu.trace_stop"() : () -> ()
    %c0_13 = arith.constant 0 : index
    %c0_14 = arith.constant 0 : index
    %13 = vector.load %arg6[%c0_13, %c0_14] : memref<1x32xf32, #tpu.memory_space<vmem>>, vector<1x32xf32>
    %14 = vector.shape_cast %13 : vector<1x32xf32> to vector<1x1x32xf32>
    %15 = vector.broadcast %14 : vector<1x1x32xf32> to vector<1x8x32xf32>
    %16 = arith.addf %12, %15 : vector<1x8x32xf32>
    %c0_15 = arith.constant 0 : index
    %c0_16 = arith.constant 0 : index
    %17 = vector.load %arg7[%c0_15, %c0_16] : memref<2x2xf32, #tpu.memory_space<vmem>>, vector<2x2xf32>
    "tpu.trace_start"() <{level = 10 : i32, message = "bqd,de->bqe"}> : () -> ()
    %cst_17 = arith.constant dense<0.000000e+00> : vector<1x8x2xf32>
    %18 = tpu.matmul %1, %17, %cst_17 {dimension_numbers = #tpu.dot_dimension_numbers<[2], [0], [0, 1], [1], [0, 0, 0, 1, 1, 1], [], []>} : vector<1x8x2xf32>, vector<2x2xf32>, vector<1x8x2xf32> -> vector<1x8x2xf32>
    "tpu.trace_stop"() : () -> ()
    "tpu.trace_start"() <{level = 10 : i32, message = "bqe,bke->bqk"}> : () -> ()
    %cst_18 = arith.constant dense<0.000000e+00> : vector<1x8x8xf32>
    %19 = tpu.matmul %18, %2, %cst_18 {dimension_numbers = #tpu.dot_dimension_numbers<[2], [2], [1], [1], [0, 0, 0, 1, 1, 1], [0], [0]>} : vector<1x8x2xf32>, vector<1x8x2xf32>, vector<1x8x8xf32> -> vector<1x8x8xf32>
    "tpu.trace_stop"() : () -> ()
    %cst_19 = arith.constant dense<0xFF800000> : vector<1x8xf32>
    %20 = vector.multi_reduction <maximumf>, %19, %cst_19 [2] : vector<1x8x8xf32> to vector<1x8xf32>
    %21 = vector.shape_cast %20 : vector<1x8xf32> to vector<1x8x1xf32>
    %22 = vector.broadcast %21 : vector<1x8x1xf32> to vector<1x8x8xf32>
    %23 = arith.subf %19, %22 : vector<1x8x8xf32>
    %24 = math.exp %23 : vector<1x8x8xf32>
    %cst_20 = arith.constant dense<0.000000e+00> : vector<1x8xf32>
    %25 = vector.multi_reduction <add>, %24, %cst_20 [2] : vector<1x8x8xf32> to vector<1x8xf32>
    %26 = vector.shape_cast %25 : vector<1x8xf32> to vector<1x8x1xf32>
    %27 = tpu.reciprocal %26 {approx = true} : vector<1x8x1xf32> -> vector<1x8x1xf32>
    %28 = vector.broadcast %27 : vector<1x8x1xf32> to vector<1x8x8xf32>
    %29 = arith.mulf %24, %28 : vector<1x8x8xf32>
    "tpu.trace_start"() <{level = 10 : i32, message = "bqk,bkf->bqf"}> : () -> ()
    %cst_21 = arith.constant dense<0.000000e+00> : vector<1x8x32xf32>
    %30 = tpu.matmul %29, %16, %cst_21 {dimension_numbers = #tpu.dot_dimension_numbers<[2], [1], [1], [2], [0, 0, 0, 1, 1, 2], [0], [0]>} : vector<1x8x8xf32>, vector<1x8x32xf32>, vector<1x8x32xf32> -> vector<1x8x32xf32>
    "tpu.trace_stop"() : () -> ()
    %c0_22 = arith.constant 0 : index
    %c0_23 = arith.constant 0 : index
    %31 = vector.load %arg8[%c0_22, %c0_23] : memref<2x32xf32, #tpu.memory_space<vmem>>, vector<2x32xf32>
    "tpu.trace_start"() <{level = 10 : i32, message = "bqd,df->bqf"}> : () -> ()
    %cst_24 = arith.constant dense<0.000000e+00> : vector<1x8x32xf32>
    %32 = tpu.matmul %1, %31, %cst_24 {dimension_numbers = #tpu.dot_dimension_numbers<[2], [0], [0, 1], [1], [0, 0, 0, 1, 1, 1], [], []>} : vector<1x8x2xf32>, vector<2x32xf32>, vector<1x8x32xf32> -> vector<1x8x32xf32>
    "tpu.trace_stop"() : () -> ()
    %c0_25 = arith.constant 0 : index
    %c0_26 = arith.constant 0 : index
    %33 = vector.load %arg9[%c0_25, %c0_26] : memref<32x32xf32, #tpu.memory_space<vmem>>, vector<32x32xf32>
    "tpu.trace_start"() <{level = 10 : i32, message = "bqr,rf->bqf"}> : () -> ()
    %cst_27 = arith.constant dense<0.000000e+00> : vector<1x8x32xf32>
    %34 = tpu.matmul %30, %33, %cst_27 {dimension_numbers = #tpu.dot_dimension_numbers<[2], [0], [0, 1], [1], [0, 0, 0, 1, 1, 1], [], []>} : vector<1x8x32xf32>, vector<32x32xf32>, vector<1x8x32xf32> -> vector<1x8x32xf32>
    "tpu.trace_stop"() : () -> ()
    %35 = arith.addf %32, %34 : vector<1x8x32xf32>
    %c0_28 = arith.constant 0 : index
    %c0_29 = arith.constant 0 : index
    %36 = vector.load %arg10[%c0_28, %c0_29] : memref<1x32xf32, #tpu.memory_space<vmem>>, vector<1x32xf32>
    %37 = vector.shape_cast %36 : vector<1x32xf32> to vector<1x1x32xf32>
    %38 = vector.broadcast %37 : vector<1x1x32xf32> to vector<1x8x32xf32>
    %39 = arith.addf %35, %38 : vector<1x8x32xf32>
    %cst_30 = arith.constant 0.000000e+00 : f32
    %40 = vector.broadcast %cst_30 : f32 to vector<1x8x32xf32>
    %41 = arith.maximumf %39, %40 : vector<1x8x32xf32>
    %c0_31 = arith.constant 0 : index
    %c0_32 = arith.constant 0 : index
    %42 = vector.load %arg11[%c0_31, %c0_32] : memref<32x2xf32, #tpu.memory_space<vmem>>, vector<32x2xf32>
    "tpu.trace_start"() <{level = 10 : i32, message = "bqh,ho->bqo"}> : () -> ()
    %cst_33 = arith.constant dense<0.000000e+00> : vector<1x8x2xf32>
    %43 = tpu.matmul %41, %42, %cst_33 {dimension_numbers = #tpu.dot_dimension_numbers<[2], [0], [0, 1], [1], [0, 0, 0, 1, 1, 1], [], []>} : vector<1x8x32xf32>, vector<32x2xf32>, vector<1x8x2xf32> -> vector<1x8x2xf32>
    "tpu.trace_stop"() : () -> ()
    %c0_34 = arith.constant 0 : index
    %c0_35 = arith.constant 0 : index
    %44 = vector.load %arg12[%c0_34, %c0_35] : memref<1x2xf32, #tpu.memory_space<vmem>>, vector<1x2xf32>
    %45 = vector.shape_cast %44 : vector<1x2xf32> to vector<1x1x2xf32>
    %46 = vector.broadcast %45 : vector<1x1x2xf32> to vector<1x8x2xf32>
    %47 = arith.addf %43, %46 : vector<1x8x2xf32>
    %cst_36 = arith.constant 0.000000e+00 : f32
    %48 = vector.broadcast %cst_36 : f32 to vector<1x8x2xf32>
    %49 = arith.maximumf %47, %48 : vector<1x8x2xf32>
    %50 = math.absf %47 : vector<1x8x2xf32>
    %cst_37 = arith.constant 0.000000e+00 : f32
    %51 = vector.broadcast %cst_37 : f32 to vector<1x8x2xf32>
    %52 = arith.subf %51, %50 : vector<1x8x2xf32>
    %53 = math.exp %52 : vector<1x8x2xf32>
    %54 = math.log1p %53 : vector<1x8x2xf32>
    %55 = arith.addf %49, %54 : vector<1x8x2xf32>
    %56 = tpu.iota {dimensions = array<i32: 2>} : vector<1x8x2xi32>
    %c1_i32 = arith.constant 1 : i32
    %57 = vector.broadcast %c1_i32 : i32 to vector<1x8x2xi32>
    %58 = arith.cmpi slt, %56, %57 : vector<1x8x2xi32>
    %cst_38 = arith.constant 0.899999976 : f32
    %59 = vector.broadcast %cst_38 : f32 to vector<1x8x2xf32>
    %60 = arith.mulf %59, %55 : vector<1x8x2xf32>
    %cst_39 = arith.constant 1.000000e-01 : f32
    %61 = vector.broadcast %cst_39 : f32 to vector<1x8x2xf32>
    %62 = arith.addf %61, %60 : vector<1x8x2xf32>
    %63 = arith.select %58, %47, %62 : vector<1x8x2xi1>, vector<1x8x2xf32>
    %c0_40 = arith.constant 0 : index
    %c0_41 = arith.constant 0 : index
    %c0_42 = arith.constant 0 : index
    %64 = vector.load %arg13[%c0_40, %c0_41, %c0_42] : memref<1x8x2xf32, #tpu.memory_space<vmem>>, vector<1x8x2xf32>
    tpu.vector_store %arg13[%c0_40, %c0_41, %c0_42], %63 {strides = array<i32>} : memref<1x8x2xf32, #tpu.memory_space<vmem>>, vector<1x8x2xf32>,
    return
  }
  func.func @transform_0(%arg0: i32) -> (i32, i32, i32) {
    %c0_i32 = arith.constant 0 : i32
    %c0_i32_0 = arith.constant 0 : i32
    %c0_i32_1 = arith.constant 0 : i32
    return %arg0, %c0_i32, %c0_i32_0 : i32, i32, i32
  }
  func.func @transform_1(%arg0: i32) -> (i32, i32, i32) {
    %c0_i32 = arith.constant 0 : i32
    %c0_i32_0 = arith.constant 0 : i32
    %c0_i32_1 = arith.constant 0 : i32
    return %arg0, %c0_i32, %c0_i32_0 : i32, i32, i32
  }
  func.func @transform_2(%arg0: i32) -> (i32, i32) {
    %c0_i32 = arith.constant 0 : i32
    %c0_i32_0 = arith.constant 0 : i32
    %c0_i32_1 = arith.constant 0 : i32
    return %c0_i32, %c0_i32_0 : i32, i32
  }
  func.func @transform_3(%arg0: i32) -> (i32, i32) {
    %c0_i32 = arith.constant 0 : i32
    %c0_i32_0 = arith.constant 0 : i32
    %c0_i32_1 = arith.constant 0 : i32
    return %c0_i32, %c0_i32_0 : i32, i32
  }
  func.func @transform_4(%arg0: i32) -> (i32, i32) {
    %c0_i32 = arith.constant 0 : i32
    %c0_i32_0 = arith.constant 0 : i32
    %c0_i32_1 = arith.constant 0 : i32
    return %c0_i32, %c0_i32_0 : i32, i32
  }
  func.func @transform_5(%arg0: i32) -> (i32, i32) {
    %c0_i32 = arith.constant 0 : i32
    %c0_i32_0 = arith.constant 0 : i32
    %c0_i32_1 = arith.constant 0 : i32
    return %c0_i32, %c0_i32_0 : i32, i32
  }
  func.func @transform_6(%arg0: i32) -> (i32, i32) {
    %c0_i32 = arith.constant 0 : i32
    %c0_i32_0 = arith.constant 0 : i32
    %c0_i32_1 = arith.constant 0 : i32
    return %c0_i32, %c0_i32_0 : i32, i32
  }
  func.func @transform_7(%arg0: i32) -> (i32, i32) {
    %c0_i32 = arith.constant 0 : i32
    %c0_i32_0 = arith.constant 0 : i32
    %c0_i32_1 = arith.constant 0 : i32
    return %c0_i32, %c0_i32_0 : i32, i32
  }
  func.func @transform_8(%arg0: i32) -> (i32, i32) {
    %c0_i32 = arith.constant 0 : i32
    %c0_i32_0 = arith.constant 0 : i32
    %c0_i32_1 = arith.constant 0 : i32
    return %c0_i32, %c0_i32_0 : i32, i32
  }
  func.func @transform_9(%arg0: i32) -> (i32, i32) {
    %c0_i32 = arith.constant 0 : i32
    %c0_i32_0 = arith.constant 0 : i32
    %c0_i32_1 = arith.constant 0 : i32
    return %c0_i32, %c0_i32_0 : i32, i32
  }
  func.func @transform_10(%arg0: i32) -> (i32, i32) {
    %c0_i32 = arith.constant 0 : i32
    %c0_i32_0 = arith.constant 0 : i32
    %c0_i32_1 = arith.constant 0 : i32
    return %c0_i32, %c0_i32_0 : i32, i32
  }
  func.func @transform_11(%arg0: i32) -> (i32, i32) {
    %c0_i32 = arith.constant 0 : i32
    %c0_i32_0 = arith.constant 0 : i32
    %c0_i32_1 = arith.constant 0 : i32
    return %c0_i32, %c0_i32_0 : i32, i32
  }
  func.func @transform_12(%arg0: i32) -> (i32, i32, i32) {
    %c0_i32 = arith.constant 0 : i32
    %c0_i32_0 = arith.constant 0 : i32
    %c0_i32_1 = arith.constant 0 : i32
    return %arg0, %c0_i32, %c0_i32_0 : i32, i32, i32
  }
}

</mosaic_0001>

<bundles_post_ra>
// kernel: tpu_custom_call.1
= control target key start
LH: loop header
LB: loop body
LE: loop exit
PB: predicated region body
PF: predicated region fallthrough
CT: control target
= control target key end

     0   :  { %s1392_s21 = smov 0   ;;  %s1514_s0 = inlined_call_operand.vmem [shape: f32[2,8,3], index: 0, kind: input, shape index: {}]   ;;  %s1515_s1 = inlined_call_operand.vmem [shape: f32[2,8,2], index: 1, kind: input, shape index: {}]   ;;  %s1516_s2 = inlined_call_operand.vmem [shape: f32[3,32], index: 2, kind: input, shape index: {}]   ;;  %s1517_s3 = inlined_call_operand.vmem [shape: f32[1,32], index: 3, kind: input, shape index: {}]   ;;  %s1518_s4 = inlined_call_operand.vmem [shape: f32[32,32], index: 4, kind: input, shape index: {}]   ;;  %s1519_s5 = inlined_call_operand.vmem [shape: f32[1,32], index: 5, kind: input, shape index: {}]   ;;  %s1520_s6 = inlined_call_operand.vmem [shape: f32[2,2], index: 6, kind: input, shape index: {}]   ;;  %s1521_s7 = inlined_call_operand.vmem [shape: f32[2,32], index: 7, kind: input, shape index: {}]   ;;  %s1522_s8 = inlined_call_operand.vmem [shape: f32[32,32], index: 8, kind: input, shape index: {}]   ;;  %s1523_s9 = inlined_call_operand.vmem [shape: f32[1,32], index: 9, kind: input, shape index: {}]   ;;  %s1524_s10 = inlined_call_operand.vmem [shape: f32[32,2], index: 10, kind: input, shape index: {}]   ;;  %s1525_s11 = inlined_call_operand.vmem [shape: f32[1,2], index: 11, kind: input, shape index: {}]   ;;  %s1526_s12 = inlined_call_operand.vmem [shape: f32[2,8,2], index: 12, kind: output, shape index: {}]  }
   0x1 LB: > { %s1170_s22 = sadd.s32 4294967295, %s1322_s21   ;;  %p1174_p0 = scmp.ge.s32.totalorder %s1322_s21, 1  ;;  %s1322_s21 = sphi %s1392_s21, %s22_s21  }
   0x2   : > { %p370_p1 = scmp.lt.s32.totalorder %s1322_s21, 3 }
   0x4   : > { %p371_p2 = pnand %p1174_p0, %p370_p1 }
   0x5   : > { %v428_v0 = vld [vmem:[%s1516_s2] sm:$0x7] (!%p371_p2)  ;;  %vm440_vm0 = vcmask (!%p371_p2), 1042432   ;;  %p414_p3 = scmp.lt.s32.totalorder (!%p371_p2), %s1170_s22, 1  ;;  %v1324_v1 = vmov (!%p371_p2), 0.0   ;;  %vm1325_vm1 = vmmov (!%p371_p2), 0  }
   0x6   : > { %374 = sbr.rel (%p371_p2) target bundleno = 1444 (0x5a4), region = 68  ;;  %1221 = vmatprep.subr.mxu0 (!%p371_p2), %v1324_v1  ;;  %1223 = vmatprep.mubr.msk.f32.mxu0 (!%p371_p2), %vm1325_vm1, %v1324_v1  ;;  %v1326_v2 = vmov (!%p371_p2), 0.0|0.0   ;;  %v515_v3 = vld [vmem:[%s1518_s4] sm:$0xff] (!%p371_p2)  ;;  %v516_v4 = vld [vmem:[%s1518_s4 + $0x8] sm:$0xff] (!%p371_p2)  ;;  %vm436_vm2 = vcmask (!%p371_p2), 23552   ;;  %vm605_vm3 = vcmask (!%p371_p2), 1041408  }
   0x7   : > { %1222 = vmatpush3.msk.msra.mxu0 (!%p371_p2), %vm440_vm0, %v428_v0  ;;  %1279 = vmatprep.subr.bf16.mxu1 (!%p371_p2), %v1326_v2  ;;  %v1280_v5 = vpack.c.bf16 (!%p371_p2), %v516_v4, %v515_v3  ;;  %v600_v6 = vld [vmem:[%s1520_s6] sm:$0x3] (!%p371_p2)  ;;  %vm601_vm4 = vcmask (!%p371_p2), 15360   ;;  %v517_v9 = vld [vmem:[%s1518_s4 + $0x10] sm:$0xff] (!%p371_p2)  ;;  %v518_v10 = vld [vmem:[%s1518_s4 + $0x18] sm:$0xff] (!%p371_p2)  ;;  %vm526_vm5 = vcmask (!%p371_p2), 261120  }
   0x8   : > { %1237 = vmatprep.subr.mxu0 (!%p371_p2), %v1324_v1  ;;  %1234 = vmatprep.mubr.msk.f32.mxu1 (!%p371_p2), %vm1325_vm1, %v1324_v1  ;;  %v1283_v11 = vpack.c.bf16 (!%p371_p2), %v518_v10, %v517_v9  ;;  %v1178_v12 = vld [vmem:[%s1517_s3] ss:$0 sm:$0xff] (!%p371_p2)  ;;  %vm754_vm6 = vcmask (!%p371_p2), 64512   ;;  %v841_v34 = vld [vmem:[%s1522_s8 + $0x8] sm:$0xff] (!%p371_p2)  ;;  %v842_v38 = vld [vmem:[%s1522_s8 + $0x10] sm:$0xff] (!%p371_p2) }
   0x9   : > { %1281 = vmatpush3.bf16.msra.mxu1 (!%p371_p2), %v1280_v5  ;;  %v1181_v19 = vld [vmem:[%s1519_s5] ss:$0 sm:$0xff] (!%p371_p2)  ;;  %v843_v39 = vld [vmem:[%s1522_s8 + $0x18] sm:$0xff] (!%p371_p2)  ;;  %v1000_v46 = vld [vmem:[%s1524_s10 + $0x8] sm:$0xff] (!%p371_p2)  ;;  %v1098_v5 = vlaneseq (!%p371_p2) }
   0xa   : > { %1282 = vmatprep.subr.bf16.mxu1 (!%p371_p2), %v1326_v2  ;;  %v839_v31 = vld [vmem:[%s1521_s7] sm:$0x3] (!%p371_p2)  ;;  %v1289_v40 = vpack.c.bf16 (!%p371_p2), %v843_v39, %v842_v38  ;;  %v1001_v48 = vld [vmem:[%s1524_s10 + $0x10] sm:$0xff] (!%p371_p2)  ;;  %v1002_v49 = vld [vmem:[%s1524_s10 + $0x18] sm:$0xff] (!%p371_p2) }
   0xb   : > { %v840_v33 = vld [vmem:[%s1522_s8] sm:$0xff] (!%p371_p2)  ;;  %v1295_v50 = vpack.c.bf16 (!%p371_p2), %v1002_v49, %v1001_v48 }
   0xc   : > { %v1286_v36 = vpack.c.bf16 (!%p371_p2), %v841_v34, %v840_v33  ;;  %v999_v45 = vld [vmem:[%s1524_s10] sm:$0xff] (!%p371_p2) }
   0xd   : > { %s1528_s22 = smov (!%p414_p3, %s1170_s22), 1  ;;  %1284 = vmatpush3.bf16.msra.mxu1 %v1283_v11  ;;  %v1292_v47 = vpack.c.bf16 %v1000_v46, %v999_v45  ;;  %v1191_v52 = vld [vmem:[%s1523_s9] ss:$0 sm:$0xff]  ;;  %v1099_v11 = vand.u32 127, %v1098_v5 }
   0xe   : > { %s1416_s29 = sshll.u32 %s1528_s22, 3  ;;  %1263 = vmatprep.subr.mxu1 %v1324_v1  ;;  %v1192_v57 = vld [vmem:[%s1525_s11] ss:$0 sm:$0xff] }
   0xf   : > { %s417_s14 = scalar_lea.vmem %s1514_s0, %s1416_s29  ;;  %s421_s19 = scalar_lea.vmem %s1515_s1, %s1416_s29  ;;  %vm1100_vm8 = vcmp.lt.s32.totalorder %v1099_v11, 1 }
  0x10   : > { %v426_v7 = vld [vmem:[%s417_s14] sm:$0xff]  ;;  %s425_s20 = scalar_lea.vmem %s1526_s12, %s1416_s29 }
  0x11   : > { %1224 = vmatmul.mubr.msk.f32.vlgmr.msra.gmra.mrb[0].mxu0 %vm436_vm2, %v426_v7  ;;  %v427_v8 = vld [vmem:[%s421_s19] sm:$0xff] }
  0x12   : > { %1238 = vmatpush3.msk.msra.mxu0 %vm605_vm3, %v600_v6  ;;  %1239 = vmatprep.mubr.msk.f32.mxu0 %vm1325_vm1, %v1324_v1 }
  0x13   : > { %1242 = vmatprep.subr.mxu0 %v1324_v1 }
  0x15   : > { %1240 = vmatmul.mubr.msk.f32.vlgmr.msra.gmra.mrb[2].mxu0 %vm601_vm4, %v427_v8 }
  0x16   : > { %1244 = vmatprep.mubr.msk.f32.mxu0 %vm1325_vm1, %v1324_v1 }
  0x19   : > { %1243 = vmatpush3.xpose.msk.msra.mxu0 %vm601_vm4, %v426_v7 }
  0x1a   : > { %1247 = vmatprep.subr.mxu0 %v1324_v1 }
  0xe4   : > { %v510_v13 = vpop.f32.mrb[0].mxu0 }
  0xe5   : > { %v511_v14 = vadd.f32 %v1178_v12, %v510_v13  ;;  %v1225_v15 = vpop.f32.mrb[1].mxu0 }
  0xe7   : > { %v514_v16 = vmax.f32 %v511_v14, 0.0 }
  0xe8   : > { %v675_v17 = vpop.f32.mrb[2].mxu0 }
  0xe9   : > { %1235 = vmatmul.mubr.msk.f32.vlgmr.msra.gmra.mrb[0].mxu1 %vm526_vm5, %v514_v16  ;;  %v1241_v18 = vpop.f32.mrb[3].mxu0  ;;  %1245 = vmatmul.mubr.msk.f32.vlgmr.msra.gmra.mrb[4].mxu0 %vm601_vm4, %v675_v17 }
  0xea   : > { %1249 = vmatprep.mubr.msk.f32.mxu0 %vm1325_vm1, %v1324_v1  ;;  %1265 = vmatprep.mubr.msk.f32.mxu1 %vm1325_vm1, %v1324_v1 }
  0xeb   : > { %1264 = vmatpush3.msk.msra.mxu1 %vm605_vm3, %v839_v31 }
  0xec   : > { %1291 = vmatprep.subr.bf16.mxu1 %v1326_v2 }
  0xed   : > { %1266 = vmatmul.mubr.msk.f32.vlgmr.msra.gmra.mrb[2].mxu1 %vm601_vm4, %v427_v8 }
  0xee   : > { %1276 = vmatprep.mubr.msk.f32.mxu1 %vm1325_vm1, %v1324_v1  ;;  %1293 = vmatpush3.bf16.msra.mxu1 %v1292_v47 }
  0xef   : > { %1294 = vmatprep.subr.bf16.mxu1 %v1326_v2 }
  0xf2   : > { %1296 = vmatpush3.bf16.msra.mxu1 %v1295_v50 }
 0x1bc   : > { %v596_v20 = vpop.f32.mrb[0].mxu1  ;;  %v750_v21 = vpop.f32.mrb[4].mxu0 }
 0x1bd   : > { %v597_v22 = vadd.f32 %v1181_v19, %v596_v20  ;;  %v1236_v23 = vpop.f32.mrb[1].mxu1  ;;  %v1246_v24 = vpop.f32.mrb[5].mxu0  ;;  %v755_v25 = vsel %vm754_vm6, %v750_v21, -inf }
 0x1be   : > { %756 = vmax.xlane.f32.xlu0 %v755_v25 }
 0x1bf   : > { %1248 = vmatpush3.msra.mxu0 %v597_v22 }
 0x1c0   : > { %1285 = vmatprep.subr.bf16.mxu0 %v1326_v2  ;;  %v986_v41 = vpop.f32.mrb[2].mxu1 }
 0x1c1   : > { %v1267_v42 = vpop.f32.mrb[3].mxu1 }
 0x24b   : > { %v757_v26 = vpop.xlane.xlu0 %756 }
 0x24c   : > { %v758_v27 = vsub.f32 %v750_v21, %v757_v26 }
 0x24e   : > { %v759_v28 = vmul.f32 1.442695, %v758_v27 }
 0x250   : > { %1308 = vpow2.f32 %v759_v28 }
 0x25a   : > { %v1309_v29 = vpop.eup %1308 }
 0x25b   : > { %v761_v30 = vsel %vm754_vm6, %v1309_v29, 0.0 }
 0x25c   : > { %762 = vadd.xlane.f32.xlu0 %v761_v30 }
 0x2e9   : > { %v763_v32 = vpop.xlane.xlu0 %762 }
 0x2ea   : > { %1310 = vrcp.f32 %v763_v32 }
 0x2f4   : > { %v1311_v35 = vpop.eup %1310 }
 0x2f5   : > { %v765_v37 = vmul.f32 %v1311_v35, %v1309_v29 }
 0x2f7   : > { %1250 = vmatmul.mubr.msk.f32.vlgmr.msra.gmra.mrb[6].mxu0 %vm754_vm6, %v765_v37 }
 0x2f8   : > { %1287 = vmatpush3.bf16.msra.mxu0 %v1286_v36  ;;  %1260 = vmatprep.mubr.msk.f32.mxu0 %vm1325_vm1, %v1324_v1 }
 0x2f9   : > { %1288 = vmatprep.subr.bf16.mxu0 %v1326_v2 }
 0x2fc   : > { %1290 = vmatpush3.bf16.msra.mxu0 %v1289_v40 }
 0x3ca   : > { %v835_v43 = vpop.f32.mrb[6].mxu0 }
 0x3cb   : > { %v1251_v44 = vpop.f32.mrb[7].mxu0  ;;  %1261 = vmatmul.mubr.msk.f32.vlgmr.msra.gmra.mrb[8].mxu0 %vm526_vm5, %v835_v43 }
 0x49e   : > { %v913_v51 = vpop.f32.mrb[8].mxu0 }
 0x49f   : > { %v987_v53 = vadd.f32 %v986_v41, %v913_v51  ;;  %v1262_v54 = vpop.f32.mrb[9].mxu0 }
 0x4a1   : > { %v997_v55 = vadd.f32 %v1191_v52, %v987_v53 }
 0x4a3   : > { %v998_v56 = vmax.f32 %v997_v55, 0.0 }
 0x4a5   : > { %1277 = vmatmul.mubr.msk.f32.vlgmr.msra.gmra.mrb[4].mxu1 %vm526_vm5, %v998_v56 }
 0x578   : > { %v1079_v58 = vpop.f32.mrb[4].mxu1 }
 0x579   : > { %v1080_v59 = vadd.f32 %v1192_v57, %v1079_v58  ;;  %v1278_v60 = vpop.f32.mrb[5].mxu1 }
 0x57b   : > { %v1084_v61 = vand.u32 2147483647, %v1080_v59  ;;  %v1083_v9 = vmax.f32 %v1080_v59, 0.0 }
 0x57d   : > { %v1085_v62 = vsub.f32 0.0, %v1084_v61 }
 0x57f   : > { %v1086_v63 = vmul.f32 1.442695, %v1085_v62 }
 0x581   : > { %1312 = vpow2.f32 %v1086_v63 }
 0x58b   : > { %v1313_v0 = vpop.eup %1312 }
 0x58c   : > { %v1088_v1 = vadd.f32 1.0, %v1313_v0  ;;  %v1091_v2 = vmul.f32 -0.5, %v1313_v0  ;;  %v1094_v4 = vand.u32 2147483647, %v1313_v0 }
 0x58e   : > { %1314 = vlog2.f32 %v1088_v1  ;;  %v1092_v3 = vadd.f32 1.0, %v1091_v2  ;;  %vm1095_vm7 = vcmp.lt.f32.partialorder %v1094_v4, 0.0004427343 }
 0x590   : > { %v1093_v8 = vmul.f32 %v1313_v0, %v1092_v3 }
 0x598   : > { %v1315_v6 = vpop.eup %1314 }
 0x599   : > { %v1090_v7 = vmul.f32 0.6931472, %v1315_v6 }
 0x59b   : > { %v1096_v10 = vsel %vm1095_vm7, %v1093_v8, %v1090_v7 }
 0x59c   : > { %v1097_v12 = vadd.f32 %v1096_v10, %v1083_v9 }
 0x59e   : > { %v1101_v13 = vmul.f32 0.9, %v1097_v12 }
 0x5a0   : > { %v1102_v14 = vadd.f32 0.1, %v1101_v13 }
 0x5a2   : > { %v1103_v15 = vsel %vm1100_vm8, %v1080_v59, %v1102_v14 }
 0x5a3   : > { %1104 = vst.msk [vmem:[%s425_s20] sm:$0xff] %vm601_vm4, %v1103_v15 }
 0x5a4 PF: > { %s22_s21 = sadd.s32 1, %s1322_s21  }
 0x5a5   : > { %p19_p4 = scmp.ge.s32.totalorder %s22_s21, 4  }
 0x5a7   :  { %21 = sbr.rel (!%p19_p4) target bundleno = 1 (0x1), region = 101 }

</bundles_post_ra>
